<compile_context>
chip_gen: v7x
topology: tpu7x:2x2x1
jax: 0.10.0
libtpu: 0.0.40
codegen_flags: <defaults>
</compile_context>

<pallas_src>
import jax
import jax.numpy as jnp
from jax.experimental import pallas as pl
from jax.experimental.pallas import tpu as pltpu

_LANES = 128  # lane-dense padded output width (Linear out_features 4 -> 128)


def _bbox_head_kernel(x_ref, w_ref, b_ref, o_ref, acc_ref):
    # x_ref : (b_blk, C, hw_tile)   input activations (f32 or bf16)
    # w_ref : (C, 128)              f32 W^T with 1/(H*W) folded in, lane-padded
    # b_ref : (1, 128)              f32 bias, lane-padded
    # o_ref : (b_blk, 128)          f32 sigmoid output, lane-padded
    # acc_ref: (b_blk, C, 128)      f32 lane-shaped partial-sum accumulator
    k = pl.program_id(1)

    @pl.when(k == 0)
    def _():
        acc_ref[...] = jnp.zeros_like(acc_ref)

    hw_tile = x_ref.shape[-1]
    n_full = hw_tile // _LANES
    rem = hw_tile - n_full * _LANES

    # Lane-group accumulation: one VPU add per input element, no per-chunk XLU
    # cross-lane reduce.  Slices are 128-lane aligned -> plain vreg adds.
    acc = acc_ref[...]
    for g in range(n_full):
        acc = acc + x_ref[:, :, g * _LANES:(g + 1) * _LANES].astype(jnp.float32)
    if rem:
        tail = x_ref[:, :, n_full * _LANES:].astype(jnp.float32)  # (b_blk, C, rem)
        acc = acc + jnp.pad(tail, ((0, 0), (0, 0), (0, _LANES - rem)))
    acc_ref[...] = acc

    @pl.when(k == pl.num_programs(1) - 1)
    def _():
        # Single deferred 128 -> 1 reduce, then MXU matmul + bias + sigmoid.
        pooled = jnp.sum(acc_ref[...], axis=-1)                   # (b_blk, C)
        logits = jnp.dot(pooled, w_ref[...],
                         preferred_element_type=jnp.float32) + b_ref[...]
        o_ref[...] = jax.nn.sigmoid(logits).astype(o_ref.dtype)


def _pick_batch_block(B):
    """Return (b_blk, padded_B).  b_blk is a multiple of 8 (or the full tiny
    extent) so the output block's sublane dim is always legal, and it is capped
    at 8 so per-step tiles stay small on every TPU generation.  B >= 16 yields
    >= 2 batch blocks -> both v7x TensorCores get work on the parallel axis."""
    if B <= 8:
        return B, B                      # tiny batch: no zero-padding traffic
    b_pad = -(-B // 8) * 8
    return 8, b_pad


def _pick_hw_tile(HW, row_bytes, max_tile_bytes):
    """Largest legal HW chunk.  Prefer a single full-extent chunk; only split
    (into multiple-of-128 divisors of HW) when one chunk exceeds the budget."""
    if HW * row_bytes <= max_tile_bytes:
        return HW
    best = None
    t = _LANES
    while t < HW:
        if HW % t == 0 and t * row_bytes <= max_tile_bytes:
            best = t
        t += _LANES
    # No legal split fits the budget: fall back to the full extent and let the
    # computed vmem_limit_bytes absorb it (compile fails loudly if impossible).
    return best if best is not None else HW


def bbox_head_forward(z, weight, bias, *, max_tile_bytes=4 << 20):
    """z: (B, C, H, W) f32/bf16; weight: (4, C) (PyTorch layout); bias: (4,)."""
    B, C, H, W = z.shape
    HW = H * W
    n_out = weight.shape[0]

    # Fold the 1/(H*W) mean into the f32 weight; pad N=4 to a dense 128 lanes.
    w = weight.T.astype(jnp.float32) / jnp.float32(HW)            # (C, 4)
    w = jnp.pad(w, ((0, 0), (0, _LANES - n_out)))                 # (C, 128)
    b = jnp.pad(bias.astype(jnp.float32), (0, _LANES - n_out)).reshape(1, _LANES)

    b_blk, b_pad = _pick_batch_block(B)
    x = z.reshape(B, C, HW)                                       # free view
    if b_pad != B:
        x = jnp.pad(x, ((0, b_pad - B), (0, 0), (0, 0)))

    hw_tile = _pick_hw_tile(HW, row_bytes=b_blk * C * x.dtype.itemsize,
                            max_tile_bytes=max_tile_bytes)
    grid = (b_pad // b_blk, HW // hw_tile)

    # VMEM footprint (double-buffered inputs/outputs + resident accumulator).
    x_buf = b_blk * C * hw_tile * x.dtype.itemsize
    vmem_bytes = (2 * (x_buf + C * _LANES * 4 + _LANES * 4 + b_blk * _LANES * 4)
                  + b_blk * C * _LANES * 4)
    vmem_limit = max(32 << 20, int(vmem_bytes * 5 // 4))

    flops = 2 * b_pad * C * HW + 2 * b_pad * C * _LANES
    bytes_accessed = (b_pad * C * HW * x.dtype.itemsize
                      + C * _LANES * 4 + _LANES * 4 + b_pad * _LANES * 4)

    out = pl.pallas_call(
        _bbox_head_kernel,
        out_shape=jax.ShapeDtypeStruct((b_pad, _LANES), jnp.float32),
        grid_spec=pltpu.PrefetchScalarGridSpec(
            num_scalar_prefetch=0,
            grid=grid,
            in_specs=[
                pl.BlockSpec((b_blk, C, hw_tile), lambda bi, k: (bi, 0, k)),
                pl.BlockSpec((C, _LANES), lambda bi, k: (0, 0)),
                pl.BlockSpec((1, _LANES), lambda bi, k: (0, 0)),
            ],
            out_specs=pl.BlockSpec((b_blk, _LANES), lambda bi, k: (bi, 0)),
            scratch_shapes=[pltpu.VMEM((b_blk, C, _LANES), jnp.float32)],
        ),
        compiler_params=pltpu.CompilerParams(
            dimension_semantics=("parallel", "arbitrary"),
            vmem_limit_bytes=vmem_limit,
        ),
        cost_estimate=pl.CostEstimate(
            flops=flops,
            transcendentals=b_pad * _LANES,
            bytes_accessed=bytes_accessed,
        ),
    )(x, w, b)
    return out[:B, :n_out]


if __name__ == "__main__":
    # adapter='CNN' -> num_inputs = 256
    B, C, H, W = 2, 256, 16, 16

    key = jax.random.PRNGKey(0)
    kz, kw, kb = jax.random.split(key, 3)

    z = jax.random.normal(kz, (B, C, H, W), dtype=jnp.float32)

    # Deterministic Linear(256, 4) params (PyTorch-style uniform init range).
    bound = 1.0 / jnp.sqrt(jnp.float32(C))
    weight = jax.random.uniform(kw, (4, C), minval=-bound, maxval=bound,
                                dtype=jnp.float32)
    bias = jax.random.uniform(kb, (4,), minval=-bound, maxval=bound,
                              dtype=jnp.float32)

    out = jax.block_until_ready(bbox_head_forward(z, weight, bias))

    # Sanity check against a pure-JAX reference of the same forward pass.
    ref = jax.nn.sigmoid(jnp.mean(z, axis=(2, 3)) @ weight.T + bias)
    assert out.shape == (B, 4)
    assert jnp.allclose(out, ref, atol=1e-5, rtol=1e-5)

    print("KERNEL_OK")
</pallas_src>

<mosaic_0001>
module attributes {stable_mosaic.version = 11 : i64} {
  func.func @_bbox_head_kernel(%arg0: i32, %arg1: i32, %arg2: memref<2x256x256xf32, #tpu.memory_space<vmem>>, %arg3: memref<256x128xf32, #tpu.memory_space<vmem>>, %arg4: memref<1x128xf32, #tpu.memory_space<vmem>>, %arg5: memref<2x128xf32, #tpu.memory_space<vmem>>, %arg6: memref<2x256x128xf32, #tpu.memory_space<vmem>>) attributes {dimension_semantics = [#tpu.dimension_semantics<parallel>, #tpu.dimension_semantics<arbitrary>], iteration_bounds = array<i64: 1, 1>, scalar_prefetch = 0 : i64, scratch_operands = 1 : i64, tpu.core_type = #tpu.core_type<tc>, window_params = [{transform_indices = @transform_0, window_bounds = array<i64: 2, 256, 256>}, {pipeline_mode = #tpu.pipeline_mode<synchronous>, transform_indices = @transform_1, window_bounds = array<i64: 256, 128>}, {pipeline_mode = #tpu.pipeline_mode<synchronous>, transform_indices = @transform_2, window_bounds = array<i64: 1, 128>}, {transform_indices = @transform_3, window_bounds = array<i64: 2, 128>}]} {
    %c0_i32 = arith.constant 0 : i32
    %0 = arith.cmpi eq, %arg1, %c0_i32 : i32
    %1 = arith.extui %0 : i1 to i32
    %c0_i32_0 = arith.constant 0 : i32
    %2 = arith.cmpi ne, %1, %c0_i32_0 : i32
    scf.if %2 {
      %cst = arith.constant 0.000000e+00 : f32
      %12 = vector.broadcast %cst : f32 to vector<2x256x128xf32>
      %c0_13 = arith.constant 0 : index
      %c0_14 = arith.constant 0 : index
      %c0_15 = arith.constant 0 : index
      %13 = vector.load %arg6[%c0_13, %c0_14, %c0_15] : memref<2x256x128xf32, #tpu.memory_space<vmem>>, vector<2x256x128xf32>
      tpu.vector_store %arg6[%c0_13, %c0_14, %c0_15], %12 {strides = array<i32>} : memref<2x256x128xf32, #tpu.memory_space<vmem>>, vector<2x256x128xf32>,
    } else {
    }
    %c0 = arith.constant 0 : index
    %c0_1 = arith.constant 0 : index
    %c0_2 = arith.constant 0 : index
    %3 = vector.load %arg6[%c0, %c0_1, %c0_2] : memref<2x256x128xf32, #tpu.memory_space<vmem>>, vector<2x256x128xf32>
    %c0_3 = arith.constant 0 : index
    %c0_4 = arith.constant 0 : index
    %c0_5 = arith.constant 0 : index
    %4 = vector.load %arg2[%c0_3, %c0_4, %c0_5] : memref<2x256x256xf32, #tpu.memory_space<vmem>>, vector<2x256x128xf32>
    %5 = arith.addf %3, %4 : vector<2x256x128xf32>
    %c0_6 = arith.constant 0 : index
    %c0_7 = arith.constant 0 : index
    %c128 = arith.constant 128 : index
    %6 = vector.load %arg2[%c0_6, %c0_7, %c128] : memref<2x256x256xf32, #tpu.memory_space<vmem>>, vector<2x256x128xf32>
    %7 = arith.addf %5, %6 : vector<2x256x128xf32>
    %c0_8 = arith.constant 0 : index
    %c0_9 = arith.constant 0 : index
    %c0_10 = arith.constant 0 : index
    %8 = vector.load %arg6[%c0_8, %c0_9, %c0_10] : memref<2x256x128xf32, #tpu.memory_space<vmem>>, vector<2x256x128xf32>
    tpu.vector_store %arg6[%c0_8, %c0_9, %c0_10], %7 {strides = array<i32>} : memref<2x256x128xf32, #tpu.memory_space<vmem>>, vector<2x256x128xf32>,
    %c0_i32_11 = arith.constant 0 : i32
    %9 = arith.cmpi eq, %arg1, %c0_i32_11 : i32
    %10 = arith.extui %9 : i1 to i32
    %c0_i32_12 = arith.constant 0 : i32
    %11 = arith.cmpi ne, %10, %c0_i32_12 : i32
    scf.if %11 {
      %c0_13 = arith.constant 0 : index
      %c0_14 = arith.constant 0 : index
      %c0_15 = arith.constant 0 : index
      %12 = vector.load %arg6[%c0_13, %c0_14, %c0_15] : memref<2x256x128xf32, #tpu.memory_space<vmem>>, vector<2x256x128xf32>
      %cst = arith.constant dense<0.000000e+00> : vector<2x256xf32>
      %13 = vector.multi_reduction <add>, %12, %cst [2] : vector<2x256x128xf32> to vector<2x256xf32>
      %c0_16 = arith.constant 0 : index
      %c0_17 = arith.constant 0 : index
      %14 = vector.load %arg3[%c0_16, %c0_17] : memref<256x128xf32, #tpu.memory_space<vmem>>, vector<256x128xf32>
      %cst_18 = arith.constant dense<0.000000e+00> : vector<2x128xf32>
      %15 = tpu.matmul %13, %14, %cst_18 {dimension_numbers = #tpu.dot_dimension_numbers<[1], [0], [0], [1], [0, 0, 1, 1], [], []>} : vector<2x256xf32>, vector<256x128xf32>, vector<2x128xf32> -> vector<2x128xf32>
      %c0_19 = arith.constant 0 : index
      %c0_20 = arith.constant 0 : index
      %16 = vector.load %arg4[%c0_19, %c0_20] : memref<1x128xf32, #tpu.memory_space<vmem>>, vector<1x128xf32>
      %17 = vector.broadcast %16 : vector<1x128xf32> to vector<2x128xf32>
      %18 = arith.addf %15, %17 : vector<2x128xf32>
      %19 = arith.negf %18 : vector<2x128xf32>
      %20 = math.exp %19 : vector<2x128xf32>
      %cst_21 = arith.constant 1.000000e+00 : f32
      %21 = vector.broadcast %cst_21 : f32 to vector<2x128xf32>
      %22 = arith.addf %21, %20 : vector<2x128xf32>
      %23 = arith.divf %21, %22 : vector<2x128xf32>
      %c0_22 = arith.constant 0 : index
      %c0_23 = arith.constant 0 : index
      %24 = vector.load %arg5[%c0_22, %c0_23] : memref<2x128xf32, #tpu.memory_space<vmem>>, vector<2x128xf32>
      tpu.vector_store %arg5[%c0_22, %c0_23], %23 {strides = array<i32>} : memref<2x128xf32, #tpu.memory_space<vmem>>, vector<2x128xf32>,
    } else {
    }
    return
  }
  func.func @transform_0(%arg0: i32, %arg1: i32) -> (i32, i32, i32) {
    %c0_i32 = arith.constant 0 : i32
    %c0_i32_0 = arith.constant 0 : i32
    return %arg0, %c0_i32, %arg1 : i32, i32, i32
  }
  func.func @transform_1(%arg0: i32, %arg1: i32) -> (i32, i32) {
    %c0_i32 = arith.constant 0 : i32
    %c0_i32_0 = arith.constant 0 : i32
    %c0_i32_1 = arith.constant 0 : i32
    return %c0_i32, %c0_i32_0 : i32, i32
  }
  func.func @transform_2(%arg0: i32, %arg1: i32) -> (i32, i32) {
    %c0_i32 = arith.constant 0 : i32
    %c0_i32_0 = arith.constant 0 : i32
    %c0_i32_1 = arith.constant 0 : i32
    return %c0_i32, %c0_i32_0 : i32, i32
  }
  func.func @transform_3(%arg0: i32, %arg1: i32) -> (i32, i32) {
    %c0_i32 = arith.constant 0 : i32
    %c0_i32_0 = arith.constant 0 : i32
    return %arg0, %c0_i32 : i32, i32
  }
}

</mosaic_0001>

<bundles_post_ra>
// kernel: tpu_custom_call.1
= control target key start
LH: loop header
LB: loop body
LE: loop exit
PB: predicated region body
PF: predicated region fallthrough
CT: control target
= control target key end

     0   :  { %8 = vsyncpa [#allocation4], 0  ;;  %s1705_s0 = inlined_call_operand.hbm [shape: f32[2,256,256], index: 0, kind: input, shape index: {}]   ;;  %s1706_s1 = inlined_call_operand.hbm [shape: f32[256,128], index: 1, kind: input, shape index: {}]   ;;  %s1707_s2 = inlined_call_operand.vmem [shape: f32[1,128], index: 2, kind: input, shape index: {}]   ;;  %s1708_s3 = inlined_call_operand.hbm [shape: f32[2,128], index: 3, kind: output, shape index: {}]  }
   0x1   :  { %9 = vsyncpa [#allocation7], 0 }
   0x2   :  { %10 = vsyncpa [#allocation5], 0  ;;  %s1391_s12 = smov [#allocation3]   ;;  %s1319_s16 = scalar_lea.hbm %s1705_s0, 16384 }
   0x3   :  { %s16_s13 = sshll.u32 %s1391_s12, 4  ;;  %p1320_p0 = scmp.ne.s32.totalorder %s1705_s0, %s1319_s16  ;;  %s17_s13 = int_to_ptr.vmem [resolvable:$true] %s16_s13 }
   0x4   :  { %p1323_p1 = scmp.lt.u32.totalorder %s1319_s16, %s1705_s0 }
   0x6   :  { %p1325_p2 = pnand %p1323_p1, %p1320_p0 }
   0x8   :  { %1328 = shalt.err (!%p1325_p2)
}
   0x9   :  { %s1329_s21 = scalar_lea.vmem %s17_s13, 16384  ;;  %p1334_p4 = scmp.lt.s32.totalorder %s17_s13, %s17_s13 }
   0xa   :  { %p1330_p3 = scmp.ne.s32.totalorder %s17_s13, %s1329_s21  ;;  %p1335_p5 = scmp.lt.s32.totalorder %s1329_s21, %s1329_s21 }
   0xc   :  { %p1336_p6 = por %p1335_p5, %p1334_p4 }
   0xe   :  { %p1337_p7 = pnand %p1336_p6, %p1330_p3 }
  0x10   :  { %1340 = shalt.err (!%p1337_p7)
}
  0x11   :  { %s1392_s22 = smov 256   ;;  %s1393_s23 = smov 16  }
  0x12   :  { %22 = dma.hbm_to_vmem [thread:$0]  %s1705_s0, 16384, %s17_s13, [#allocation4], %s1392_s22, %s1392_s22, %s1393_s23  }
  0x13   :  { %s1394_s26 = smov [#allocation6]   ;;  %s1341_s30 = scalar_lea.hbm %s1706_s1, 4096 }
  0x14   :  { %s28_s27 = sshll.u32 %s1394_s26, 4  ;;  %p1342_p8 = scmp.ne.s32.totalorder %s1706_s1, %s1341_s30  ;;  %s29_s27 = int_to_ptr.vmem [resolvable:$true] %s28_s27 }
  0x15   :  { %p1345_p9 = scmp.lt.u32.totalorder %s1341_s30, %s1706_s1 }
  0x17   :  { %p1347_p10 = pnand %p1345_p9, %p1342_p8 }
  0x19   :  { %1350 = shalt.err (!%p1347_p10)
}
  0x1a   :  { %s1351_s8 = scalar_lea.vmem %s29_s27, 4096  ;;  %p1356_p12 = scmp.lt.s32.totalorder %s29_s27, %s29_s27 }
  0x1b   :  { %p1352_p11 = scmp.ne.s32.totalorder %s29_s27, %s1351_s8  ;;  %p1357_p13 = scmp.lt.s32.totalorder %s1351_s8, %s1351_s8 }
  0x1d   :  { %p1358_p0 = por %p1357_p13, %p1356_p12 }
  0x1f   :  { %p1359_p1 = pnand %p1358_p0, %p1352_p11 }
  0x21   :  { %1362 = shalt.err (!%p1359_p1)
}
  0x22   :  { %s1395_s0 = smov 128   ;;  %s1396_s9 = smov 8  }
  0x23   :  { %34 = dma.hbm_to_vmem [thread:$0]  %s1706_s1, 4096, %s29_s27, [#allocation7], %s1395_s0, %s1395_s0, %s1396_s9  }
  0x24   :  { %1385 = dma.done.wait [#allocation4], 16384  }
  0x25   :  { %1386 = vsyncadd [#allocation4], 4294950912 }
  0x26   :  { %1387 = dma.done.wait [#allocation7], 4096  }
  0x27   :  { %1388 = vsyncadd [#allocation7], 4294963200  ;;  %v223_v0 = vld [vmem:[#allocation3 + $0x300] sm:$0xff]  ;;  %v351_v1 = vld [vmem:[#allocation3 + $0x308] sm:$0xff]  ;;  %vm804_vm0 = vcmask 130112   ;;  %vm811_vm1 = vcmask 195712  }
  0x28   :  { %v191_v2 = vld [vmem:[#allocation3 + $0x100] sm:$0xff]  ;;  %v415_v3 = vadd.f32 %v351_v1, %v223_v0  ;;  %v319_v4 = vld [vmem:[#allocation3 + $0x108] sm:$0xff]  ;;  %v224_v5 = vld [vmem:[#allocation3 + $0x310] sm:$0xff]  ;;  %vm818_vm2 = vcmask 261312   ;;  %vm825_vm3 = vcmask 326912   ;;  %vm832_vm4 = vcmask 392512  }
  0x29   :  { %v352_v6 = vld [vmem:[#allocation3 + $0x318] sm:$0xff]  ;;  %v383_v7 = vadd.f32 %v319_v4, %v191_v2  ;;  %v192_v8 = vld [vmem:[#allocation3 + $0x110] sm:$0xff]  ;;  %v175_v14 = vld [vmem:[#allocation3] sm:$0xff]  ;;  %vm839_vm5 = vcmask 458112   ;;  %vm846_vm6 = vcmask 523712   ;;  %vm853_vm7 = vcmask 589312  }
  0x2a   :  { %v320_v9 = vld [vmem:[#allocation3 + $0x118] sm:$0xff]  ;;  %658 = vadd.xlane.f32.xlu1 %v415_v3  ;;  %v416_v10 = vadd.f32 %v352_v6, %v224_v5  ;;  %v176_v12 = vld [vmem:[#allocation3 + $0x10] sm:$0xff]  ;;  %v303_v15 = vld [vmem:[#allocation3 + $0x8] sm:$0xff]  ;;  %vm860_vm8 = vcmask 654912   ;;  %vm867_vm9 = vcmask 720512   ;;  %vm874_vm10 = vcmask 786112  }
  0x2b   :  { %594 = vadd.xlane.f32.xlu0 %v383_v7  ;;  %v384_v11 = vadd.f32 %v320_v9, %v192_v8  ;;  %v304_v13 = vld [vmem:[#allocation3 + $0x18] sm:$0xff]  ;;  %v367_v17 = vadd.f32 %v303_v15, %v175_v14  ;;  %v207_v18 = vld [vmem:[#allocation3 + $0x200] sm:$0xff]  ;;  %v335_v19 = vld [vmem:[#allocation3 + $0x208] sm:$0xff]  ;;  %vm881_vm11 = vcmask 851712   ;;  %vm888_vm12 = vcmask 917312   ;;  %s1397_s13 = smov [#allocation8]  }
  0x2c   :  { %v368_v16 = vadd.f32 %v304_v13, %v176_v12  ;;  %v193_v20 = vld [vmem:[#allocation3 + $0x120] sm:$0xff]  ;;  %v321_v21 = vld [vmem:[#allocation3 + $0x128] sm:$0xff]  ;;  %v399_v22 = vadd.f32 %v335_v19, %v207_v18  ;;  %v208_v26 = vld [vmem:[#allocation3 + $0x210] sm:$0xff]  ;;  %vm895_vm13 = vcmask 982912   ;;  %vm902_vm14 = vcmask 1048512   ;;  %s1229_s14 = sshll.u32 %s1397_s13, 4  ;;  %s1230_s14 = int_to_ptr.vmem [resolvable:$true] %s1229_s14 }
  0x2d   :  { %v385_v23 = vadd.f32 %v321_v21, %v193_v20  ;;  %v225_v24 = vld [vmem:[#allocation3 + $0x320] sm:$0xff]  ;;  %v353_v25 = vld [vmem:[#allocation3 + $0x328] sm:$0xff]  ;;  %v336_v27 = vld [vmem:[#allocation3 + $0x218] sm:$0xff]  ;;  %vm1141_vm15 = vcmask 1041409   ;;  %s1363_s15 = scalar_lea.vmem %s1230_s14, 32  ;;  %p1368_p3 = scmp.lt.s32.totalorder %s1230_s14, %s1230_s14 }
  0x2e   :  { %660 = vadd.xlane.f32.xlu1 %v416_v10  ;;  %v417_v28 = vadd.f32 %v353_v25, %v225_v24  ;;  %v400_v29 = vadd.f32 %v336_v27, %v208_v26  ;;  %v194_v30 = vld [vmem:[#allocation3 + $0x130] sm:$0xff]  ;;  %v322_v31 = vld [vmem:[#allocation3 + $0x138] sm:$0xff]  ;;  %v177_v32 = vld [vmem:[#allocation3 + $0x20] sm:$0xff]  ;;  %p1364_p2 = scmp.ne.s32.totalorder %s1230_s14, %s1363_s15  ;;  %p1369_p4 = scmp.lt.s32.totalorder %s1363_s15, %s1363_s15 }
  0x2f   :  { %596 = vadd.xlane.f32.xlu0 %v384_v11  ;;  %v305_v33 = vld [vmem:[#allocation3 + $0x28] sm:$0xff]  ;;  %v386_v34 = vadd.f32 %v322_v31, %v194_v30  ;;  %v226_v36 = vld [vmem:[#allocation3 + $0x330] sm:$0xff]  ;;  %v354_v37 = vld [vmem:[#allocation3 + $0x338] sm:$0xff] }
  0x30   :  { %v369_v35 = vadd.f32 %v305_v33, %v177_v32  ;;  %v209_v38 = vld [vmem:[#allocation3 + $0x220] sm:$0xff]  ;;  %v337_v39 = vld [vmem:[#allocation3 + $0x228] sm:$0xff]  ;;  %v418_v40 = vadd.f32 %v354_v37, %v226_v36  ;;  %v178_v44 = vld [vmem:[#allocation3 + $0x30] sm:$0xff]  ;;  %p1370_p5 = por %p1369_p4, %p1368_p3 }
  0x31   :  { %v401_v41 = vadd.f32 %v337_v39, %v209_v38  ;;  %v195_v42 = vld [vmem:[#allocation3 + $0x140] sm:$0xff]  ;;  %v323_v43 = vld [vmem:[#allocation3 + $0x148] sm:$0xff]  ;;  %v306_v45 = vld [vmem:[#allocation3 + $0x38] sm:$0xff] }
  0x32   :  { %564 = vadd.xlane.f32.xlu1 %v368_v16  ;;  %v387_v46 = vadd.f32 %v323_v43, %v195_v42  ;;  %v370_v47 = vadd.f32 %v306_v45, %v178_v44  ;;  %v227_v48 = vld [vmem:[#allocation3 + $0x340] sm:$0xff]  ;;  %v355_v49 = vld [vmem:[#allocation3 + $0x348] sm:$0xff]  ;;  %v210_v50 = vld [vmem:[#allocation3 + $0x230] sm:$0xff]  ;;  %p1371_p6 = pnand %p1370_p5, %p1364_p2 }
  0x33   :  { %562 = vadd.xlane.f32.xlu0 %v367_v17  ;;  %v338_v51 = vld [vmem:[#allocation3 + $0x238] sm:$0xff]  ;;  %v419_v52 = vadd.f32 %v355_v49, %v227_v48  ;;  %v196_v54 = vld [vmem:[#allocation3 + $0x150] sm:$0xff]  ;;  %v179_v56 = vld [vmem:[#allocation3 + $0x40] sm:$0xff] }
  0x34   :  { %v402_v53 = vadd.f32 %v338_v51, %v210_v50  ;;  %v324_v55 = vld [vmem:[#allocation3 + $0x158] sm:$0xff]  ;;  %v307_v57 = vld [vmem:[#allocation3 + $0x48] sm:$0xff]  ;;  %v228_v60 = vld [vmem:[#allocation3 + $0x350] sm:$0xff] }
  0x35   :  { %v388_v58 = vadd.f32 %v324_v55, %v196_v54  ;;  %v371_v59 = vadd.f32 %v307_v57, %v179_v56  ;;  %v356_v61 = vld [vmem:[#allocation3 + $0x358] sm:$0xff]  ;;  %v211_v62 = vld [vmem:[#allocation3 + $0x240] sm:$0xff]  ;;  %v339_v63 = vld [vmem:[#allocation3 + $0x248] sm:$0xff] }
  0x36   :  { %626 = vadd.xlane.f32.xlu1 %v399_v22  ;;  %v420_v0 = vadd.f32 %v356_v61, %v228_v60  ;;  %v403_v1 = vadd.f32 %v339_v63, %v211_v62  ;;  %v197_v2 = vld [vmem:[#allocation3 + $0x160] sm:$0xff]  ;;  %v325_v3 = vld [vmem:[#allocation3 + $0x168] sm:$0xff]  ;;  %v180_v4 = vld [vmem:[#allocation3 + $0x50] sm:$0xff] }
  0x37   :  { %598 = vadd.xlane.f32.xlu0 %v385_v23  ;;  %v308_v5 = vld [vmem:[#allocation3 + $0x58] sm:$0xff]  ;;  %v389_v6 = vadd.f32 %v325_v3, %v197_v2  ;;  %v229_v8 = vld [vmem:[#allocation3 + $0x360] sm:$0xff]  ;;  %v357_v9 = vld [vmem:[#allocation3 + $0x368] sm:$0xff] }
  0x38   :  { %v372_v7 = vadd.f32 %v308_v5, %v180_v4  ;;  %v212_v10 = vld [vmem:[#allocation3 + $0x250] sm:$0xff]  ;;  %v340_v11 = vld [vmem:[#allocation3 + $0x258] sm:$0xff]  ;;  %v421_v12 = vadd.f32 %v357_v9, %v229_v8  ;;  %v181_v16 = vld [vmem:[#allocation3 + $0x60] sm:$0xff] }
  0x39   :  { %v404_v13 = vadd.f32 %v340_v11, %v212_v10  ;;  %v198_v14 = vld [vmem:[#allocation3 + $0x170] sm:$0xff]  ;;  %v326_v15 = vld [vmem:[#allocation3 + $0x178] sm:$0xff]  ;;  %v309_v17 = vld [vmem:[#allocation3 + $0x68] sm:$0xff] }
  0x3a   :  { %662 = vadd.xlane.f32.xlu1 %v417_v28  ;;  %v390_v18 = vadd.f32 %v326_v15, %v198_v14  ;;  %v373_v19 = vadd.f32 %v309_v17, %v181_v16  ;;  %v230_v20 = vld [vmem:[#allocation3 + $0x370] sm:$0xff]  ;;  %v358_v21 = vld [vmem:[#allocation3 + $0x378] sm:$0xff]  ;;  %v213_v22 = vld [vmem:[#allocation3 + $0x260] sm:$0xff] }
  0x3b   :  { %628 = vadd.xlane.f32.xlu0 %v400_v29  ;;  %v341_v23 = vld [vmem:[#allocation3 + $0x268] sm:$0xff]  ;;  %v422_v24 = vadd.f32 %v358_v21, %v230_v20  ;;  %v199_v26 = vld [vmem:[#allocation3 + $0x180] sm:$0xff]  ;;  %v182_v28 = vld [vmem:[#allocation3 + $0x70] sm:$0xff] }
  0x3c   :  { %v405_v25 = vadd.f32 %v341_v23, %v213_v22  ;;  %v327_v27 = vld [vmem:[#allocation3 + $0x188] sm:$0xff]  ;;  %v310_v29 = vld [vmem:[#allocation3 + $0x78] sm:$0xff]  ;;  %v231_v32 = vld [vmem:[#allocation3 + $0x380] sm:$0xff] }
  0x3d   :  { %v391_v30 = vadd.f32 %v327_v27, %v199_v26  ;;  %v374_v31 = vadd.f32 %v310_v29, %v182_v28  ;;  %v359_v33 = vld [vmem:[#allocation3 + $0x388] sm:$0xff]  ;;  %v200_v38 = vld [vmem:[#allocation3 + $0x190] sm:$0xff]  ;;  %v328_v39 = vld [vmem:[#allocation3 + $0x198] sm:$0xff] }
  0x3e   :  { %600 = vadd.xlane.f32.xlu1 %v386_v34  ;;  %v214_v34 = vld [vmem:[#allocation3 + $0x270] sm:$0xff]  ;;  %v423_v36 = vadd.f32 %v359_v33, %v231_v32  ;;  %v392_v42 = vadd.f32 %v328_v39, %v200_v38  ;;  %v360_v45 = vld [vmem:[#allocation3 + $0x398] sm:$0xff]  ;;  %v201_v50 = vld [vmem:[#allocation3 + $0x1a0] sm:$0xff] }
  0x3f   :  { %566 = vadd.xlane.f32.xlu0 %v369_v35  ;;  %v342_v35 = vld [vmem:[#allocation3 + $0x278] sm:$0xff]  ;;  %v232_v44 = vld [vmem:[#allocation3 + $0x390] sm:$0xff]  ;;  %v329_v51 = vld [vmem:[#allocation3 + $0x1a8] sm:$0xff] }
  0x40   :  { %v406_v37 = vadd.f32 %v342_v35, %v214_v34  ;;  %v424_v48 = vadd.f32 %v360_v45, %v232_v44  ;;  %v393_v54 = vadd.f32 %v329_v51, %v201_v50  ;;  %v233_v56 = vld [vmem:[#allocation3 + $0x3a0] sm:$0xff]  ;;  %v361_v57 = vld [vmem:[#allocation3 + $0x3a8] sm:$0xff]  ;;  %v202_v62 = vld [vmem:[#allocation3 + $0x1b0] sm:$0xff] }
  0x41   :  { %v425_v60 = vadd.f32 %v361_v57, %v233_v56  ;;  %v330_v63 = vld [vmem:[#allocation3 + $0x1b8] sm:$0xff]  ;;  %v234_v4 = vld [vmem:[#allocation3 + $0x3b0] sm:$0xff]  ;;  %v203_v10 = vld [vmem:[#allocation3 + $0x1c0] sm:$0xff] }
  0x42   :  { %664 = vadd.xlane.f32.xlu1 %v418_v40  ;;  %v183_v40 = vld [vmem:[#allocation3 + $0x80] sm:$0xff]  ;;  %v394_v2 = vadd.f32 %v330_v63, %v202_v62  ;;  %v362_v5 = vld [vmem:[#allocation3 + $0x3b8] sm:$0xff]  ;;  %v331_v11 = vld [vmem:[#allocation3 + $0x1c8] sm:$0xff] }
  0x43   :  { %630 = vadd.xlane.f32.xlu0 %v401_v41  ;;  %v311_v41 = vld [vmem:[#allocation3 + $0x88] sm:$0xff]  ;;  %v426_v8 = vadd.f32 %v362_v5, %v234_v4  ;;  %v395_v14 = vadd.f32 %v331_v11, %v203_v10  ;;  %v235_v16 = vld [vmem:[#allocation3 + $0x3c0] sm:$0xff]  ;;  %v204_v22 = vld [vmem:[#allocation3 + $0x1d0] sm:$0xff] }
  0x44   :  { %v375_v43 = vadd.f32 %v311_v41, %v183_v40  ;;  %v363_v17 = vld [vmem:[#allocation3 + $0x3c8] sm:$0xff]  ;;  %v332_v23 = vld [vmem:[#allocation3 + $0x1d8] sm:$0xff]  ;;  %v236_v28 = vld [vmem:[#allocation3 + $0x3d0] sm:$0xff] }
  0x45   :  { %v427_v20 = vadd.f32 %v363_v17, %v235_v16  ;;  %v396_v26 = vadd.f32 %v332_v23, %v204_v22  ;;  %v364_v29 = vld [vmem:[#allocation3 + $0x3d8] sm:$0xff]  ;;  %v205_v34 = vld [vmem:[#allocation3 + $0x1e0] sm:$0xff]  ;;  %v333_v35 = vld [vmem:[#allocation3 + $0x1e8] sm:$0xff] }
  0x46   :  { %602 = vadd.xlane.f32.xlu1 %v387_v46  ;;  %v215_v46 = vld [vmem:[#allocation3 + $0x280] sm:$0xff]  ;;  %v428_v32 = vadd.f32 %v364_v29, %v236_v28  ;;  %v397_v38 = vadd.f32 %v333_v35, %v205_v34  ;;  %v365_v41 = vld [vmem:[#allocation3 + $0x3e8] sm:$0xff]  ;;  %v206_v45 = vld [vmem:[#allocation3 + $0x1f0] sm:$0xff] }
  0x47   :  { %568 = vadd.xlane.f32.xlu0 %v370_v47  ;;  %v343_v47 = vld [vmem:[#allocation3 + $0x288] sm:$0xff]  ;;  %v237_v40 = vld [vmem:[#allocation3 + $0x3e0] sm:$0xff]  ;;  %v238_v57 = vld [vmem:[#allocation3 + $0x3f0] sm:$0xff] }
  0x48   :  { %v407_v49 = vadd.f32 %v343_v47, %v215_v46  ;;  %v429_v44 = vadd.f32 %v365_v41, %v237_v40  ;;  %v706_v46 = vld [vmem:[#allocation6 + $0x80] sm:$0xff]  ;;  %v707_v47 = vld [vmem:[#allocation6 + $0x88] sm:$0xff]  ;;  %v692_v63 = vld [vmem:[#allocation6 + $0x10] sm:$0xff] }
  0x49   :  { %v1276_v50 = vpack.c.bf16 %v707_v47, %v706_v46  ;;  %v690_v51 = vld [vmem:[#allocation6] sm:$0xff]  ;;  %v222_v5 = vld [vmem:[#allocation3 + $0x2f0] sm:$0xff]  ;;  %v697_v22 = vld [vmem:[#allocation6 + $0x38] sm:$0xff] }
  0x4a   :  { %666 = vadd.xlane.f32.xlu1 %v419_v52  ;;  %v184_v52 = vld [vmem:[#allocation3 + $0x90] sm:$0xff]  ;;  %v694_v11 = vld [vmem:[#allocation6 + $0x20] sm:$0xff]  ;;  %v699_v28 = vld [vmem:[#allocation6 + $0x48] sm:$0xff] }
  0x4b   :  { %632 = vadd.xlane.f32.xlu0 %v402_v53  ;;  %v312_v53 = vld [vmem:[#allocation3 + $0x98] sm:$0xff]  ;;  %1277 = vmatprep.subr.bf16.mxu0 %v1276_v50  ;;  %v712_v17 = vld [vmem:[#allocation6 + $0xb0] sm:$0xff]  ;;  %v702_v40 = vld [vmem:[#allocation6 + $0x60] sm:$0xff] }
  0x4c   :  { %v376_v55 = vadd.f32 %v312_v53, %v184_v52  ;;  %v691_v52 = vld [vmem:[#allocation6 + $0x8] sm:$0xff]  ;;  %v189_v53 = vld [vmem:[#allocation3 + $0xe0] sm:$0xff]  ;;  %v701_v34 = vld [vmem:[#allocation6 + $0x58] sm:$0xff] }
  0x4d   :  { %v703_v41 = vld [vmem:[#allocation6 + $0x68] sm:$0xff]  ;;  %v704_v47 = vld [vmem:[#allocation6 + $0x70] sm:$0xff] }
  0x4e   :  { %604 = vadd.xlane.f32.xlu1 %v388_v58  ;;  %v216_v58 = vld [vmem:[#allocation3 + $0x290] sm:$0xff] }
  0x4f   :  { %570 = vadd.xlane.f32.xlu0 %v371_v59  ;;  %v344_v59 = vld [vmem:[#allocation3 + $0x298] sm:$0xff] }
  0x50   :  { %v408_v61 = vadd.f32 %v344_v59, %v216_v58  ;;  %v708_v58 = vld [vmem:[#allocation6 + $0x90] sm:$0xff]  ;;  %v709_v59 = vld [vmem:[#allocation6 + $0x98] sm:$0xff] }
  0x51   :  { %v1280_v62 = vpack.c.bf16 %v709_v59, %v708_v58 }
  0x52   :  { %668 = vadd.xlane.f32.xlu1 %v420_v0  ;;  %v185_v0 = vld [vmem:[#allocation3 + $0xa0] sm:$0xff] }
  0x53   :  { %634 = vadd.xlane.f32.xlu0 %v403_v1  ;;  %v313_v1 = vld [vmem:[#allocation3 + $0xa8] sm:$0xff] }
  0x54   :  { %v377_v3 = vadd.f32 %v313_v1, %v185_v0  ;;  %v693_v0 = vld [vmem:[#allocation6 + $0x18] sm:$0xff]  ;;  %v221_v1 = vld [vmem:[#allocation3 + $0x2e0] sm:$0xff] }
  0x56   :  { %606 = vadd.xlane.f32.xlu1 %v389_v6  ;;  %v217_v6 = vld [vmem:[#allocation3 + $0x2a0] sm:$0xff] }
  0x57   :  { %572 = vadd.xlane.f32.xlu0 %v372_v7  ;;  %v345_v7 = vld [vmem:[#allocation3 + $0x2a8] sm:$0xff] }
  0x58   :  { %v409_v9 = vadd.f32 %v345_v7, %v217_v6  ;;  %v710_v6 = vld [vmem:[#allocation6 + $0xa0] sm:$0xff]  ;;  %v711_v7 = vld [vmem:[#allocation6 + $0xa8] sm:$0xff] }
  0x59   :  { %v1284_v10 = vpack.c.bf16 %v711_v7, %v710_v6 }
  0x5a   :  { %670 = vadd.xlane.f32.xlu1 %v421_v12  ;;  %v186_v12 = vld [vmem:[#allocation3 + $0xb0] sm:$0xff] }
  0x5b   :  { %636 = vadd.xlane.f32.xlu0 %v404_v13  ;;  %v314_v13 = vld [vmem:[#allocation3 + $0xb8] sm:$0xff] }
  0x5c   :  { %v378_v15 = vadd.f32 %v314_v13, %v186_v12  ;;  %v695_v12 = vld [vmem:[#allocation6 + $0x28] sm:$0xff]  ;;  %v190_v13 = vld [vmem:[#allocation3 + $0xf0] sm:$0xff] }
  0x5e   :  { %608 = vadd.xlane.f32.xlu1 %v390_v18  ;;  %v218_v18 = vld [vmem:[#allocation3 + $0x2b0] sm:$0xff] }
  0x5f   :  { %574 = vadd.xlane.f32.xlu0 %v373_v19  ;;  %v346_v19 = vld [vmem:[#allocation3 + $0x2b8] sm:$0xff] }
  0x60   :  { %v410_v21 = vadd.f32 %v346_v19, %v218_v18  ;;  %v713_v18 = vld [vmem:[#allocation6 + $0xb8] sm:$0xff] }
  0x62   :  { %672 = vadd.xlane.f32.xlu1 %v422_v24  ;;  %v187_v24 = vld [vmem:[#allocation3 + $0xc0] sm:$0xff] }
  0x63   :  { %638 = vadd.xlane.f32.xlu0 %v405_v25  ;;  %v315_v25 = vld [vmem:[#allocation3 + $0xc8] sm:$0xff] }
  0x64   :  { %v379_v27 = vadd.f32 %v315_v25, %v187_v24  ;;  %v714_v24 = vld [vmem:[#allocation6 + $0xc0] sm:$0xff]  ;;  %v715_v25 = vld [vmem:[#allocation6 + $0xc8] sm:$0xff] }
  0x66   :  { %610 = vadd.xlane.f32.xlu1 %v391_v30  ;;  %v219_v30 = vld [vmem:[#allocation3 + $0x2c0] sm:$0xff] }
  0x67   :  { %576 = vadd.xlane.f32.xlu0 %v374_v31  ;;  %v347_v31 = vld [vmem:[#allocation3 + $0x2c8] sm:$0xff] }
  0x68   :  { %v411_v33 = vadd.f32 %v347_v31, %v219_v30  ;;  %v716_v30 = vld [vmem:[#allocation6 + $0xd0] sm:$0xff]  ;;  %v717_v31 = vld [vmem:[#allocation6 + $0xd8] sm:$0xff] }
  0x6a   :  { %674 = vadd.xlane.f32.xlu1 %v423_v36  ;;  %v188_v36 = vld [vmem:[#allocation3 + $0xd0] sm:$0xff] }
  0x6b   :  { %640 = vadd.xlane.f32.xlu0 %v406_v37  ;;  %v316_v37 = vld [vmem:[#allocation3 + $0xd8] sm:$0xff] }
  0x6c   :  { %v380_v39 = vadd.f32 %v316_v37, %v188_v36  ;;  %v793_v36 = vlaneseq  ;;  %v718_v37 = vld [vmem:[#allocation6 + $0xe0] sm:$0xff] }
  0x6e   :  { %612 = vadd.xlane.f32.xlu1 %v392_v42  ;;  %v220_v42 = vld [vmem:[#allocation3 + $0x2d0] sm:$0xff] }
  0x6f   :  { %578 = vadd.xlane.f32.xlu0 %v375_v43  ;;  %v348_v43 = vld [vmem:[#allocation3 + $0x2d8] sm:$0xff] }
  0x72   :  { %676 = vadd.xlane.f32.xlu1 %v424_v48  ;;  %v412_v48 = vadd.f32 %v348_v43, %v220_v42  ;;  %v1302_v42 = vpack.c.bf16 %v703_v41, %v702_v40  ;;  %v1442_v43 = vand.u32 127, %v793_v36 }
  0x73   :  { %642 = vadd.xlane.f32.xlu0 %v407_v49  ;;  %v334_v49 = vld [vmem:[#allocation3 + $0x1f8] sm:$0xff] }
  0x74   :  { %v398_v56 = vadd.f32 %v334_v49, %v206_v45  ;;  %v721_v45 = vld [vmem:[#allocation6 + $0xf8] sm:$0xff]  ;;  %v1444_v49 = vshrl.u32 %v793_v36, 7  ;;  %v799_v50 = vadd.s32 4294967288, %v1442_v43 }
  0x76   :  { %614 = vadd.xlane.f32.xlu1 %v393_v54  ;;  %v317_v54 = vld [vmem:[#allocation3 + $0xe8] sm:$0xff] }
  0x77   :  { %580 = vadd.xlane.f32.xlu0 %v376_v55  ;;  %v1278_v55 = vpack.c.bf16 %v691_v52, %v690_v51 }
  0x79   :  { %1279 = vmatpush3.bf16.msra.mxu0 %v1278_v55  ;;  %v802_v55 = vsub.s32 %v799_v50, %v1444_v49 }
  0x7a   :  { %678 = vadd.xlane.f32.xlu1 %v425_v60  ;;  %v381_v60 = vadd.f32 %v317_v54, %v189_v53  ;;  %1281 = vmatprep.subr.bf16.mxu0 %v1280_v62  ;;  %v797_v53 = vsub.s32 %v1442_v43, %v1444_v49  ;;  %v806_v62 = vadd.s32 4294967280, %v1442_v43 }
  0x7b   :  { %644 = vadd.xlane.f32.xlu0 %v408_v61  ;;  %v366_v61 = vld [vmem:[#allocation3 + $0x3f8] sm:$0xff] }
  0x7c   :  { %v430_v4 = vadd.f32 %v366_v61, %v238_v57 }
  0x7e   :  { %616 = vadd.xlane.f32.xlu1 %v394_v2  ;;  %v349_v2 = vld [vmem:[#allocation3 + $0x2e8] sm:$0xff] }
  0x7f   :  { %582 = vadd.xlane.f32.xlu0 %v377_v3  ;;  %v1282_v3 = vpack.c.bf16 %v693_v0, %v692_v63 }
  0x81   :  { %1283 = vmatpush3.bf16.msra.mxu0 %v1282_v3 }
  0x82   :  { %680 = vadd.xlane.f32.xlu1 %v426_v8  ;;  %v413_v8 = vadd.f32 %v349_v2, %v221_v1  ;;  %1285 = vmatprep.subr.bf16.mxu0 %v1284_v10 }
  0x83   :  { %646 = vadd.xlane.f32.xlu0 %v409_v9  ;;  %v350_v9 = vld [vmem:[#allocation3 + $0x2f8] sm:$0xff] }
  0x84   :  { %v414_v16 = vadd.f32 %v350_v9, %v222_v5  ;;  %v809_v5 = vsub.s32 %v806_v62, %v1444_v49  ;;  %v813_v9 = vadd.s32 4294967272, %v1442_v43 }
  0x86   :  { %618 = vadd.xlane.f32.xlu1 %v395_v14  ;;  %v318_v14 = vld [vmem:[#allocation3 + $0xf8] sm:$0xff] }
  0x87   :  { %584 = vadd.xlane.f32.xlu0 %v378_v15  ;;  %v1286_v15 = vpack.c.bf16 %v695_v12, %v694_v11  ;;  %v382_v19 = vadd.f32 %v318_v14, %v190_v13 }
  0x89   :  { %1287 = vmatpush3.bf16.msra.mxu0 %v1286_v15  ;;  %v816_v15 = vsub.s32 %v813_v9, %v1444_v49 }
  0x8a   :  { %682 = vadd.xlane.f32.xlu1 %v427_v20  ;;  %v1288_v20 = vpack.c.bf16 %v713_v18, %v712_v17 }
  0x8b   :  { %648 = vadd.xlane.f32.xlu0 %v410_v21  ;;  %v696_v21 = vld [vmem:[#allocation6 + $0x30] sm:$0xff] }
  0x8c   :  { %v1290_v23 = vpack.c.bf16 %v697_v22, %v696_v21  ;;  %1289 = vmatprep.subr.bf16.mxu0 %v1288_v20 }
  0x8e   :  { %620 = vadd.xlane.f32.xlu1 %v396_v26  ;;  %1291 = vmatpush3.bf16.msra.mxu0 %v1290_v23  ;;  %v1292_v26 = vpack.c.bf16 %v715_v25, %v714_v24  ;;  %v820_v23 = vadd.s32 4294967264, %v1442_v43 }
  0x8f   :  { %586 = vadd.xlane.f32.xlu0 %v379_v27  ;;  %v698_v27 = vld [vmem:[#allocation6 + $0x40] sm:$0xff] }
  0x90   :  { %v1294_v29 = vpack.c.bf16 %v699_v28, %v698_v27  ;;  %1293 = vmatprep.subr.bf16.mxu0 %v1292_v26 }
  0x92   :  { %684 = vadd.xlane.f32.xlu1 %v428_v32  ;;  %1295 = vmatpush3.bf16.msra.mxu0 %v1294_v29  ;;  %v1296_v32 = vpack.c.bf16 %v717_v31, %v716_v30  ;;  %v823_v30 = vsub.s32 %v820_v23, %v1444_v49 }
  0x93   :  { %650 = vadd.xlane.f32.xlu0 %v411_v33  ;;  %v700_v33 = vld [vmem:[#allocation6 + $0x50] sm:$0xff] }
  0x94   :  { %v1298_v35 = vpack.c.bf16 %v701_v34, %v700_v33  ;;  %1297 = vmatprep.subr.bf16.mxu0 %v1296_v32 }
  0x96   :  { %622 = vadd.xlane.f32.xlu1 %v397_v38  ;;  %1299 = vmatpush3.bf16.msra.mxu0 %v1298_v35  ;;  %v719_v38 = vld [vmem:[#allocation6 + $0xe8] sm:$0xff] }
  0x97   :  { %588 = vadd.xlane.f32.xlu0 %v380_v39  ;;  %v1300_v39 = vpack.c.bf16 %v719_v38, %v718_v37  ;;  %v827_v37 = vadd.s32 4294967256, %v1442_v43 }
  0x99   :  { %1301 = vmatprep.subr.bf16.mxu0 %v1300_v39 }
  0x9a   :  { %686 = vadd.xlane.f32.xlu1 %v429_v44  ;;  %1303 = vmatpush3.bf16.msra.mxu0 %v1302_v42  ;;  %v720_v44 = vld [vmem:[#allocation6 + $0xf0] sm:$0xff] }
  0x9b   :  { %652 = vadd.xlane.f32.xlu0 %v412_v48  ;;  %v1304_v46 = vpack.c.bf16 %v721_v45, %v720_v44  ;;  %v705_v48 = vld [vmem:[#allocation6 + $0x78] sm:$0xff]  ;;  %v830_v45 = vsub.s32 %v827_v37, %v1444_v49 }
  0x9c   :  { %v1306_v51 = vpack.c.bf16 %v705_v48, %v704_v47 }
  0x9d   :  { %1305 = vmatprep.subr.bf16.mxu0 %v1304_v46 }
  0x9e   :  { %624 = vadd.xlane.f32.xlu1 %v398_v56  ;;  %1307 = vmatpush3.bf16.msra.mxu0 %v1306_v51 }
  0x9f   :  { %590 = vadd.xlane.f32.xlu0 %v381_v60 }
  0xa2   :  { %688 = vadd.xlane.f32.xlu1 %v430_v4 }
  0xa3   :  { %654 = vadd.xlane.f32.xlu0 %v413_v8 }
  0xa6   :  { %656 = vadd.xlane.f32.xlu1 %v414_v16 }
  0xa7   :  { %592 = vadd.xlane.f32.xlu0 %v382_v19 }
  0xb7   :  { %v659_v52 = vpop.xlane.xlu1 %658 }
  0xb8   :  { %v595_v54 = vpop.xlane.xlu0 %594  ;;  %v1065_v57 = vrot.slane %v659_v52, %v797_v53 }
  0xb9   :  { %v907_v60 = vrot.slane %v595_v54, %v797_v53 }
  0xbb   :  { %v661_v56 = vpop.xlane.xlu1 %660 }
  0xbc   :  { %v1069_v58 = vrot.slane %v661_v56, %v802_v55  ;;  %v597_v59 = vpop.xlane.xlu0 %596 }
  0xbd   :  { %v911_v61 = vrot.slane %v597_v59, %v802_v55 }
  0xbe   :  { %v1070_v63 = vsel %vm804_vm0, %v1069_v58, %v1065_v57 }
  0xbf   :  { %v912_v0 = vsel %vm804_vm0, %v911_v61, %v907_v60  ;;  %v565_v1 = vpop.xlane.xlu1 %564 }
  0xc0   :  { %v803_v2 = vrot.slane %v565_v1, %v802_v55  ;;  %v563_v3 = vpop.xlane.xlu0 %562 }
  0xc1   :  { %v798_v4 = vrot.slane %v563_v3, %v797_v53 }
  0xc3   :  { %v805_v6 = vsel %vm804_vm0, %v803_v2, %v798_v4  ;;  %v627_v7 = vpop.xlane.xlu1 %626 }
  0xc4   :  { %v599_v8 = vpop.xlane.xlu0 %598  ;;  %v986_v16 = vrot.slane %v627_v7, %v797_v53  ;;  %v834_v53 = vadd.s32 4294967248, %v1442_v43 }
  0xc5   :  { %v916_v10 = vrot.slane %v599_v8, %v809_v5 }
  0xc6   :  { %v1476_v60 = vsub.s32 %v834_v53, %v1444_v49 }
  0xc7   :  { %v917_v11 = vsel %vm811_vm1, %v916_v10, %v912_v0  ;;  %v663_v12 = vpop.xlane.xlu1 %662 }
  0xc8   :  { %v1074_v13 = vrot.slane %v663_v12, %v809_v5  ;;  %v629_v14 = vpop.xlane.xlu0 %628 }
  0xc9   :  { %v990_v17 = vrot.slane %v629_v14, %v802_v55 }
  0xca   :  { %v1075_v18 = vsel %vm811_vm1, %v1074_v13, %v1070_v63 }
  0xcb   :  { %v991_v19 = vsel %vm804_vm0, %v990_v17, %v986_v16  ;;  %v601_v20 = vpop.xlane.xlu1 %600 }
  0xcc   :  { %v921_v21 = vrot.slane %v601_v20, %v816_v15  ;;  %v567_v22 = vpop.xlane.xlu0 %566 }
  0xcd   :  { %v810_v24 = vrot.slane %v567_v22, %v809_v5 }
  0xce   :  { %v922_v25 = vsel %vm818_vm2, %v921_v21, %v917_v11 }
  0xcf   :  { %v812_v26 = vsel %vm811_vm1, %v810_v24, %v805_v6  ;;  %v665_v27 = vpop.xlane.xlu1 %664 }
  0xd0   :  { %v1079_v28 = vrot.slane %v665_v27, %v816_v15  ;;  %v631_v29 = vpop.xlane.xlu0 %630 }
  0xd1   :  { %v995_v31 = vrot.slane %v631_v29, %v809_v5 }
  0xd2   :  { %v1080_v32 = vsel %vm818_vm2, %v1079_v28, %v1075_v18 }
  0xd3   :  { %v996_v33 = vsel %vm811_vm1, %v995_v31, %v991_v19  ;;  %v603_v34 = vpop.xlane.xlu1 %602 }
  0xd4   :  { %v926_v35 = vrot.slane %v603_v34, %v823_v30  ;;  %v569_v36 = vpop.xlane.xlu0 %568 }
  0xd5   :  { %v817_v38 = vrot.slane %v569_v36, %v816_v15  ;;  %v855_v36 = vadd.s32 4294967224, %v1442_v43 }
  0xd6   :  { %v927_v39 = vsel %vm825_vm3, %v926_v35, %v922_v25  ;;  %v848_v35 = vadd.s32 4294967232, %v1442_v43 }
  0xd7   :  { %v819_v40 = vsel %vm818_vm2, %v817_v38, %v812_v26  ;;  %v667_v41 = vpop.xlane.xlu1 %666 }
  0xd8   :  { %v1084_v42 = vrot.slane %v667_v41, %v823_v30  ;;  %v633_v44 = vpop.xlane.xlu0 %632  ;;  %v869_v41 = vadd.s32 4294967208, %v1442_v43 }
  0xd9   :  { %v1000_v46 = vrot.slane %v633_v44, %v816_v15  ;;  %v876_v44 = vadd.s32 4294967200, %v1442_v43 }
  0xda   :  { %v1085_v47 = vsel %vm825_vm3, %v1084_v42, %v1080_v32  ;;  %v851_v42 = vsub.s32 %v848_v35, %v1444_v49 }
  0xdb   :  { %v1001_v48 = vsel %vm818_vm2, %v1000_v46, %v996_v33  ;;  %v605_v50 = vpop.xlane.xlu1 %604  ;;  %v841_v33 = vadd.s32 4294967240, %v1442_v43  ;;  %v1554_v46 = vsub.s32 %v855_v36, %v1444_v49 }
  0xdc   :  { %v931_v51 = vrot.slane %v605_v50, %v830_v45  ;;  %v571_v52 = vpop.xlane.xlu0 %570  ;;  %v897_v50 = vadd.s32 4294967176, %v1442_v43 }
  0xdd   :  { %v824_v54 = vrot.slane %v571_v52, %v823_v30  ;;  %v844_v38 = vsub.s32 %v841_v33, %v1444_v49 }
  0xde   :  { %v932_v55 = vsel %vm832_vm4, %v931_v51, %v927_v39  ;;  %v862_v39 = vadd.s32 4294967216, %v1442_v43 }
  0xdf   :  { %v826_v56 = vsel %vm825_vm3, %v824_v54, %v819_v40  ;;  %v669_v57 = vpop.xlane.xlu1 %668 }
  0xe0   :  { %v1089_v58 = vrot.slane %v669_v57, %v830_v45  ;;  %v635_v59 = vpop.xlane.xlu0 %634  ;;  %v1563_v53 = vsub.s32 %v862_v39, %v1444_v49  ;;  %v1571_v57 = vsub.s32 %v869_v41, %v1444_v49 }
  0xe1   :  { %v1005_v61 = vrot.slane %v635_v59, %v823_v30 }
  0xe2   :  { %v1479_v62 = vsel %vm832_vm4, %v1089_v58, %v1085_v47  ;;  %v1576_v58 = vsub.s32 %v876_v44, %v1444_v49 }
  0xe3   :  { %v1006_v63 = vsel %vm825_vm3, %v1005_v61, %v1001_v48  ;;  %v607_v0 = vpop.xlane.xlu1 %606  ;;  %v890_v48 = vadd.s32 4294967184, %v1442_v43 }
  0xe4   :  { %v936_v1 = vrot.slane %v607_v0, %v1476_v60  ;;  %v573_v2 = vpop.xlane.xlu0 %572 }
  0xe5   :  { %v831_v3 = vrot.slane %v573_v2, %v830_v45  ;;  %v1584_v0 = vsub.s32 %v890_v48, %v1444_v49  ;;  %v1589_v2 = vsub.s32 %v897_v50, %v1444_v49 }
  0xe6   :  { %v1484_v4 = vsel %vm839_vm5, %v936_v1, %v932_v55 }
  0xe7   :  { %v1487_v5 = vsel %vm832_vm4, %v831_v3, %v826_v56  ;;  %v1489_v6 = vpop.xlane.xlu1 %670 }
  0xe8   :  { %v637_v7 = vpop.xlane.xlu0 %636  ;;  %v1094_v51 = vrot.slane %v1489_v6, %v1476_v60 }
  0xe9   :  { %v1010_v8 = vrot.slane %v637_v7, %v830_v45  ;;  %v883_v45 = vadd.s32 4294967192, %v1442_v43 }
  0xeb   :  { %v1492_v9 = vsel %vm832_vm4, %v1010_v8, %v1006_v63  ;;  %v609_v10 = vpop.xlane.xlu1 %608  ;;  %v1579_v59 = vsub.s32 %v883_v45, %v1444_v49 }
  0xec   :  { %v1494_v11 = vpop.xlane.xlu0 %574  ;;  %v941_v52 = vrot.slane %v609_v10, %v844_v38 }
  0xed   :  { %v838_v55 = vrot.slane %v1494_v11, %v1476_v60 }
  0xee   :  { %v942_v3 = vsel %vm846_vm6, %v941_v52, %v1484_v4 }
  0xef   :  { %v1496_v12 = vpop.xlane.xlu1 %672  ;;  %v840_v10 = vsel %vm839_vm5, %v838_v55, %v1487_v5 }
  0xf0   :  { %v1498_v13 = vpop.xlane.xlu0 %638  ;;  %v1099_v56 = vrot.slane %v1496_v12, %v844_v38 }
  0xf1   :  { %v1015_v43 = vrot.slane %v1498_v13, %v1476_v60  ;;  %v1095_v60 = vsel %vm839_vm5, %v1094_v51, %v1479_v62 }
  0xf2   :  { %v1100_v11 = vsel %vm846_vm6, %v1099_v56, %v1095_v60 }
  0xf3   :  { %v1500_v14 = vpop.xlane.xlu1 %610  ;;  %v1016_v4 = vsel %vm839_vm5, %v1015_v43, %v1492_v9 }
  0xf4   :  { %v1502_v15 = vpop.xlane.xlu0 %576  ;;  %v946_v61 = vrot.slane %v1500_v14, %v851_v42 }
  0xf5   :  { %v845_v63 = vrot.slane %v1502_v15, %v844_v38 }
  0xf6   :  { %v947_v5 = vsel %vm853_vm7, %v946_v61, %v942_v3 }
  0xf7   :  { %v1504_v16 = vpop.xlane.xlu1 %674  ;;  %v847_v15 = vsel %vm846_vm6, %v845_v63, %v840_v10 }
  0xf8   :  { %v1506_v17 = vpop.xlane.xlu0 %640  ;;  %v1104_v6 = vrot.slane %v1504_v16, %v851_v42 }
  0xf9   :  { %v1020_v7 = vrot.slane %v1506_v17, %v844_v38 }
  0xfb   :  { %v1508_v18 = vpop.xlane.xlu1 %612 }
  0xfc   :  { %v1510_v19 = vpop.xlane.xlu0 %578  ;;  %v951_v49 = vrot.slane %v1508_v18, %v1554_v46  ;;  %v1105_v18 = vsel %vm853_vm7, %v1104_v6, %v1100_v11 }
  0xfd   :  { %v852_v62 = vrot.slane %v1510_v19, %v851_v42  ;;  %v1021_v19 = vsel %vm846_vm6, %v1020_v7, %v1016_v4 }
  0xfe   :  { %v952_v33 = vsel %vm860_vm8, %v951_v49, %v947_v5 }
  0xff   :  { %v1512_v20 = vpop.xlane.xlu1 %676 }
 0x100   :  { %v1514_v21 = vpop.xlane.xlu0 %642  ;;  %v1109_v12 = vrot.slane %v1512_v20, %v1554_v46 }
 0x101   :  { %v1025_v13 = vrot.slane %v1514_v21, %v851_v42 }
 0x102   :  { %v1110_v36 = vsel %vm860_vm8, %v1109_v12, %v1105_v18 }
 0x103   :  { %v1516_v22 = vpop.xlane.xlu1 %614  ;;  %v1026_v38 = vsel %vm853_vm7, %v1025_v13, %v1021_v19 }
 0x104   :  { %v1518_v23 = vpop.xlane.xlu0 %580  ;;  %v956_v14 = vrot.slane %v1516_v22, %v1563_v53 }
 0x105   :  { %v859_v16 = vrot.slane %v1518_v23, %v1554_v46  ;;  %v854_v23 = vsel %vm853_vm7, %v852_v62, %v847_v15 }
 0x107   :  { %v1520_v24 = vpop.xlane.xlu1 %678  ;;  %v861_v39 = vsel %vm860_vm8, %v859_v16, %v854_v23 }
 0x108   :  { %v1522_v25 = vpop.xlane.xlu0 %644  ;;  %v1114_v17 = vrot.slane %v1520_v24, %v1563_v53 }
 0x109   :  { %v1030_v20 = vrot.slane %v1522_v25, %v1554_v46  ;;  %v957_v25 = vsel %vm867_vm9, %v956_v14, %v952_v33 }
 0x10a   :  { %v1115_v41 = vsel %vm867_vm9, %v1114_v17, %v1110_v36 }
 0x10b   :  { %v1524_v26 = vpop.xlane.xlu1 %616  ;;  %v1031_v44 = vsel %vm860_vm8, %v1030_v20, %v1026_v38  ;;  %v1239_v20 = vld [vmem:[%s1707_s2] ss:$0 sm:$0xff] }
 0x10c   :  { %v1526_v27 = vpop.xlane.xlu0 %582  ;;  %v961_v21 = vrot.slane %v1524_v26, %v1571_v57 }
 0x10d   :  { %v866_v24 = vrot.slane %v1526_v27, %v1563_v53 }
 0x10e   :  { %v962_v45 = vsel %vm874_vm10, %v961_v21, %v957_v25 }
 0x10f   :  { %v1528_v28 = vpop.xlane.xlu1 %680  ;;  %v868_v50 = vsel %vm867_vm9, %v866_v24, %v861_v39 }
 0x110   :  { %v1530_v29 = vpop.xlane.xlu0 %646  ;;  %v1119_v35 = vrot.slane %v1528_v28, %v1571_v57 }
 0x111   :  { %v1035_v26 = vrot.slane %v1530_v29, %v1563_v53 }
 0x112   :  { %v1120_v51 = vsel %vm874_vm10, %v1119_v35, %v1115_v41 }
 0x113   :  { %v1532_v30 = vpop.xlane.xlu1 %618  ;;  %v1036_v52 = vsel %vm867_vm9, %v1035_v26, %v1031_v44 }
 0x114   :  { %v1534_v31 = vpop.xlane.xlu0 %584  ;;  %v966_v42 = vrot.slane %v1532_v30, %v1576_v58 }
 0x115   :  { %v873_v53 = vrot.slane %v1534_v31, %v1571_v57 }
 0x116   :  { %v967_v55 = vsel %vm881_vm11, %v966_v42, %v962_v45 }
 0x117   :  { %v1536_v32 = vpop.xlane.xlu1 %682  ;;  %v875_v49 = vsel %vm874_vm10, %v873_v53, %v868_v50 }
 0x118   :  { %v1539_v34 = vpop.xlane.xlu0 %648  ;;  %v1124_v27 = vrot.slane %v1536_v32, %v1576_v58 }
 0x11a   :  { %v1125_v56 = vsel %vm881_vm11, %v1124_v27, %v1120_v51 }
 0x11b   :  { %v1543_v37 = vpop.xlane.xlu1 %620 }
 0x11c   :  { %v1547_v40 = vpop.xlane.xlu0 %586  ;;  %v971_v46 = vrot.slane %v1543_v37, %v1579_v59  ;;  %v1040_v37 = vrot.slane %v1539_v34, %v1571_v57 }
 0x11d   :  { %v880_v43 = vrot.slane %v1547_v40, %v1576_v58 }
 0x11f   :  { %v1556_v47 = vpop.xlane.xlu1 %684 }
 0x120   :  { %v1565_v54 = vpop.xlane.xlu0 %650  ;;  %v1129_v29 = vrot.slane %v1556_v47, %v1579_v59 }
 0x121   :  { %v1045_v61 = vrot.slane %v1565_v54, %v1576_v58  ;;  %v1041_v54 = vsel %vm874_vm10, %v1040_v37, %v1036_v52 }
 0x122   :  { %v1130_v31 = vsel %vm888_vm12, %v1129_v29, %v1125_v56 }
 0x123   :  { %v1586_v1 = vpop.xlane.xlu1 %622  ;;  %v1046_v62 = vsel %vm881_vm11, %v1045_v61, %v1041_v54 }
 0x124   :  { %v1597_v8 = vpop.xlane.xlu0 %588  ;;  %v976_v30 = vrot.slane %v1586_v1, %v1584_v0  ;;  %v972_v1 = vsel %vm888_vm12, %v971_v46, %v967_v55 }
 0x125   :  { %v887_v3 = vrot.slane %v1597_v8, %v1579_v59  ;;  %v882_v8 = vsel %vm881_vm11, %v880_v43, %v875_v49 }
 0x126   :  { %v977_v40 = vsel %vm895_vm13, %v976_v30, %v972_v1 }
 0x127   :  { %v687_v9 = vpop.xlane.xlu1 %686 }
 0x128   :  { %v653_v22 = vpop.xlane.xlu0 %652  ;;  %v1134_v32 = vrot.slane %v687_v9, %v1584_v0 }
 0x129   :  { %v1050_v60 = vrot.slane %v653_v22, %v1579_v59 }
 0x12a   :  { %v1135_v7 = vsel %vm895_vm13, %v1134_v32, %v1130_v31 }
 0x12b   :  { %v625_v28 = vpop.xlane.xlu1 %624  ;;  %v1051_v12 = vsel %vm888_vm12, %v1050_v60, %v1046_v62 }
 0x12c   :  { %v591_v48 = vpop.xlane.xlu0 %590  ;;  %v981_v47 = vrot.slane %v625_v28, %v1589_v2 }
 0x12d   :  { %v894_v58 = vrot.slane %v591_v48, %v1584_v0 }
 0x12e   :  { %v982_v10 = vsel %vm902_vm14, %v981_v47, %v977_v40 }
 0x12f   :  { %v689_v63 = vpop.xlane.xlu1 %688 }
 0x130   :  { %v1139_v34 = vrot.slane %v689_v63, %v1589_v2  ;;  %v655_v57 = vpop.xlane.xlu0 %654 }
 0x131   :  { %v1055_v6 = vrot.slane %v655_v57, %v1584_v0  ;;  %v889_v0 = vsel %vm888_vm12, %v887_v3, %v882_v8 }
 0x132   :  { %v1140_v11 = vsel %vm902_vm14, %v1139_v34, %v1135_v7  ;;  %v896_v16 = vsel %vm895_vm13, %v894_v58, %v889_v0 }
 0x133   :  { %v657_v4 = vpop.xlane.xlu1 %656  ;;  %v1143_v59 = vsel %vm1141_vm15, %v1140_v11, %v982_v10  ;;  %v1056_v5 = vsel %vm895_vm13, %v1055_v6, %v1051_v12 }
 0x134   :  { %v1060_v13 = vrot.slane %v657_v4, %v1589_v2  ;;  %v593_v14 = vpop.xlane.xlu0 %592  ;;  %1210 = vmatprep.mubr.f32.mxu0 %v1143_v59 }
 0x135   :  { %v901_v15 = vrot.slane %v593_v14, %v1589_v2 }
 0x136   :  { %v1061_v17 = vsel %vm902_vm14, %v1060_v13, %v1056_v5 }
 0x137   :  { %v903_v9 = vsel %vm902_vm14, %v901_v15, %v896_v16 }
 0x138   :  { %v1142_v18 = vsel %vm1141_vm15, %v1061_v17, %v903_v9 }
 0x139   :  { %1211 = vmatmul.mubr.f32.vlgmr.msra.gmra.mrb[0].mxu0 %v1142_v18 }
 0x20c   :  { %v1273_v19 = vpop.f32.mrb[0].mxu0 }
 0x20d   :  { %v1274_v21 = vpop.f32.mrb[1].mxu0 }
 0x20e   :  { %v1275_v22 = vadd.f32 %v1274_v21, %v1273_v19 }
 0x210   :  { %v1213_v33 = vadd.f32 %v1275_v22, %v1239_v20 }
 0x212   :  { %v1240_v23 = vmul.f32 -1.442695, %v1213_v33 }
 0x214   :  { %1315 = vpow2.f32 %v1240_v23 }
 0x21e   :  { %v1316_v2 = vpop.eup %1315 }
 0x21f   :  { %v1219_v24 = vadd.f32 1.0, %v1316_v2 }
 0x221   :  { %1317 = vrcp.f32 %v1219_v24 }
 0x22b   :  { %v1318_v35 = vpop.eup %1317 }
 0x22c   :  { %1222 = vst [vmem:[#allocation8] sm:$0x3] %v1318_v35 }
 0x22d   :  { %1374 = shalt.err (!%p1371_p6)
}
 0x22e   :  { %s1375_s17 = scalar_lea.hbm %s1708_s3, 32 }
 0x22f   :  { %p1376_p7 = scmp.ne.s32.totalorder %s1708_s3, %s1375_s17  ;;  %p1379_p8 = scmp.lt.u32.totalorder %s1375_s17, %s1708_s3 }
 0x231   :  { %p1381_p9 = pnand %p1379_p8, %p1376_p7 }
 0x233   :  { %1384 = shalt.err (!%p1381_p9)
}
 0x234   :  { %1232 = dma.vmem_to_hbm [thread:$0]  %s1230_s14, 32, %s1708_s3, [#allocation5]  }
 0x235   :  { %1389 = dma.done.wait [#allocation5], 32  }
 0x236   :  { %1390 = vsyncadd [#allocation5], 4294967264 }
 0x237   :  { %1236 = vsyncpa [#allocation4], 1 }
 0x238   :  { %1237 = vsyncpa [#allocation7], 1 }
 0x239   :  { %1238 = vsyncpa [#allocation5], 1 }

</bundles_post_ra>
